<compile_context>
chip_gen: v7x
topology: tpu7x:2x2x1
jax: 0.10.0
libtpu: 0.0.40
codegen_flags: <defaults>
</compile_context>

<pallas_src>
import functools

import jax
import jax.numpy as jnp
from jax.experimental import pallas as pl
from jax.experimental.pallas import tpu as pltpu

# "minus infinity" sentinel for the masked running max.  exp(x - _NEG_INIT)
# and exp(_NEG_INIT - x) behave exactly as needed for the online LSE:
#   exp(_NEG_INIT - finite) == 0.0 (underflow), exp(_NEG_INIT - _NEG_INIT) == 1.0.
_NEG_INIT = -1.0e30


def _circle_loss_kernel(sim_ref, mask_ref, out_ref,
                        m_p_ref, m_n_ref, s_p_ref, s_n_ref,
                        *, m, gamma, n_valid, col_tile, num_col_tiles, mask_cols):
    """One (row-tile, column-tile) step of the streaming CircleLoss forward.

    sim_ref  : (tb, tn) similarity tile (any float dtype, cast to f32 here)
    mask_ref : (tb, tn) int8 tile, nonzero == positive pair
    out_ref  : (tb, 1)  per-row softplus(lse_p + lse_n), written at last column tile
    *_ref    : (tb, 1)  f32 VMEM scratch carrying the online LSE state
    """
    j = pl.program_id(1)

    @pl.when(j == 0)
    def _init():
        m_p_ref[...] = jnp.full(m_p_ref.shape, _NEG_INIT, jnp.float32)
        m_n_ref[...] = jnp.full(m_n_ref.shape, _NEG_INIT, jnp.float32)
        s_p_ref[...] = jnp.zeros(s_p_ref.shape, jnp.float32)
        s_n_ref[...] = jnp.zeros(s_n_ref.shape, jnp.float32)

    sim = sim_ref[...].astype(jnp.float32)          # (tb, tn)
    p = mask_ref[...] != 0                          # bool, True = positive pair

    if mask_cols:
        # Column-padding validity mask (only traced when N was padded).
        col = jax.lax.broadcasted_iota(jnp.int32, p.shape, 1) + j * col_tile
        valid = col < n_valid
        pos = jnp.logical_and(p, valid)
        neg = jnp.logical_and(jnp.logical_not(p), valid)
    else:
        pos = p
        neg = jnp.logical_not(p)

    # No explicit pos/neg multiplies on ap/an: every downstream consumer
    # selects the right set with jnp.where, so the products are redundant.
    ap = jnp.maximum(1.0 + m - sim, 0.0)            # clamp_min(1 + m - sim, 0)
    an = jnp.maximum(sim + m, 0.0)                  # clamp_min(sim + m, 0)
    logit_p = -ap * (sim - (1.0 - m)) * gamma       # delta_p = 1 - m
    logit_n = an * (sim - m) * gamma                # delta_n = m

    # ---- online (streaming) masked log-sum-exp over the column tiles ----
    tile_max_p = jnp.max(jnp.where(pos, logit_p, _NEG_INIT), axis=-1, keepdims=True)
    tile_max_n = jnp.max(jnp.where(neg, logit_n, _NEG_INIT), axis=-1, keepdims=True)
    new_m_p = jnp.maximum(m_p_ref[...], tile_max_p)
    new_m_n = jnp.maximum(m_n_ref[...], tile_max_n)

    # One exp per element: positive and negative sets are disjoint, and the
    # selected shifted values are always <= 0 so exp never overflows.  Values
    # at invalid (padded) lanes are discarded by the selects below.
    shifted = jnp.where(pos, logit_p - new_m_p, logit_n - new_m_n)
    e = jnp.exp(shifted)
    tile_sum_p = jnp.sum(jnp.where(pos, e, 0.0), axis=-1, keepdims=True)
    tile_sum_n = jnp.sum(jnp.where(neg, e, 0.0), axis=-1, keepdims=True)

    s_p_ref[...] = s_p_ref[...] * jnp.exp(m_p_ref[...] - new_m_p) + tile_sum_p
    s_n_ref[...] = s_n_ref[...] * jnp.exp(m_n_ref[...] - new_m_n) + tile_sum_n
    m_p_ref[...] = new_m_p
    m_n_ref[...] = new_m_n

    @pl.when(j == num_col_tiles - 1)
    def _finalize():
        z = (m_p_ref[...] + jnp.log(s_p_ref[...])
             + m_n_ref[...] + jnp.log(s_n_ref[...]))            # (tb, 1)
        # numerically stable softplus == nn.Softplus()
        out_ref[...] = jnp.maximum(z, 0.0) + jnp.log1p(jnp.exp(-jnp.abs(z)))


def _round_up(x: int, mult: int) -> int:
    return ((x + mult - 1) // mult) * mult


def _vmem_budget():
    """(double-buffered working-set budget, vmem_limit_bytes) per generation."""
    try:
        cap = int(getattr(pltpu.get_tpu_info(), "vmem_capacity_bytes", 0)) or 64 * 2**20
    except Exception:
        cap = 64 * 2**20                      # conservative (v7x per-TC physical)
    budget = min(24 * 2**20, cap // 4)        # v5e/v6e: 24 MiB, v7x: 16 MiB
    limit = min((cap * 3) // 4, budget + 12 * 2**20)   # scratch + compiler headroom
    return budget, limit


def _choose_tiles(B: int, N: int, sim_itemsize: int):
    """Pick (tb, b_pad, tn, n_pad, vmem_limit).  tb % 32 == 0, tn % 128 == 0."""
    budget, vmem_limit = _vmem_budget()

    # Row (anchor) tile: capped at 1024, balanced over the row tiles.
    ROW_ALIGN, ROW_CAP = 32, 1024
    b_min = _round_up(B, ROW_ALIGN)
    nb = -(-b_min // ROW_CAP)
    tb = _round_up(-(-b_min // nb), ROW_ALIGN)
    b_pad = nb * tb

    # Column (pair) tile: as wide as the budget allows (double-buffered
    # sim + int8 mask), balanced over the column tiles.
    COL_ALIGN = 128
    n_min = _round_up(N, COL_ALIGN)
    per_col_bytes = 2 * tb * (sim_itemsize + 1)        # 2 buffers * (sim + int8 mask)
    tn_cap = max(COL_ALIGN, (budget // per_col_bytes) // COL_ALIGN * COL_ALIGN)
    nc = -(-n_min // tn_cap)
    tn = _round_up(-(-n_min // nc), COL_ALIGN)
    n_pad = nc * tn
    return tb, b_pad, tn, n_pad, vmem_limit


def circle_loss(sim: jax.Array, mask: jax.Array, m: float, gamma: float,
                *, row_tile: int | None = None, col_tile: int | None = None) -> jax.Array:
    """sim: [B, N] float, mask: [B, N] bool, m/gamma: python floats. Scalar loss."""
    B, N = sim.shape
    tb, b_pad, tn, n_pad, vmem_limit = _choose_tiles(B, N, sim.dtype.itemsize)
    if row_tile is not None:                       # testing / tuning override
        tb = _round_up(row_tile, 32)
        b_pad = _round_up(B, tb)
    if col_tile is not None:
        tn = _round_up(col_tile, 128)
        n_pad = _round_up(N, tn)

    mask_i8 = mask.astype(jnp.int8)                # 1 byte/elem in HBM
    sim_in = sim                                   # native dtype; cast to f32 in-kernel
    if b_pad != B or n_pad != N:
        sim_in = jnp.pad(sim_in, ((0, b_pad - B), (0, n_pad - N)))
        mask_i8 = jnp.pad(mask_i8, ((0, b_pad - B), (0, n_pad - N)))

    num_col_tiles = n_pad // tn
    kernel = functools.partial(
        _circle_loss_kernel,
        m=float(m), gamma=float(gamma),
        n_valid=N, col_tile=tn, num_col_tiles=num_col_tiles,
        mask_cols=(n_pad != N))

    per_row = pl.pallas_call(
        kernel,
        out_shape=jax.ShapeDtypeStruct((b_pad, 1), jnp.float32),
        grid=(b_pad // tb, num_col_tiles),
        in_specs=[
            pl.BlockSpec((tb, tn), lambda i, j: (i, j)),   # sim tile
            pl.BlockSpec((tb, tn), lambda i, j: (i, j)),   # mask tile (int8)
        ],
        out_specs=pl.BlockSpec((tb, 1), lambda i, j: (i, 0)),
        scratch_shapes=[pltpu.VMEM((tb, 1), jnp.float32)] * 4,   # m_p, m_n, s_p, s_n
        compiler_params=pltpu.CompilerParams(
            dimension_semantics=("parallel", "arbitrary"),
            vmem_limit_bytes=int(vmem_limit)),
    )(sim_in, mask_i8)

    # Tiny final mean over the real rows in plain JAX (keeps the row grid parallel).
    return jnp.mean(per_row[:B, 0])


def circle_loss_ref(sim, mask, m, gamma):
    """Pure-JAX reference mirroring the PyTorch forward."""
    p = mask.astype(jnp.float32)
    n = 1.0 - p
    ap = jnp.maximum(1.0 + m - sim, 0.0) * p
    an = jnp.maximum(sim + m, 0.0) * n
    logit_p = -ap * (sim - (1.0 - m)) * gamma
    logit_n = an * (sim - m) * gamma

    def mlse(logit, msk):
        other = 1.0 - msk
        s = jnp.max(logit - 1.0e7 * other, axis=-1, keepdims=True)
        e = jnp.where(other > 0.5, 0.0, jnp.exp(logit - s))
        return (s + jnp.log(jnp.sum(e, axis=-1, keepdims=True)))[:, 0]

    z = mlse(logit_p, p) + mlse(logit_n, n)
    return jnp.mean(jax.nn.softplus(z))


def _make_inputs(key, B, N):
    k_sim, k_mask = jax.random.split(key)
    sim = jax.random.uniform(k_sim, (B, N), dtype=jnp.float32, minval=-1.0, maxval=1.0)
    mask = jax.random.bernoulli(k_mask, p=0.3, shape=(B, N))
    # guarantee every row has at least one positive and one negative pair
    mask = mask.at[:, 0].set(True).at[:, 1].set(False)
    return sim, mask


if __name__ == "__main__":
    GAMMA = 64.0     # __init__-time parameter
    M = 0.25         # forward-time margin scalar

    key = jax.random.PRNGKey(0)
    k1, k2 = jax.random.split(key)

    # Case 1: small, single tile on both axes (auto-chosen tiling).
    sim1, mask1 = _make_inputs(k1, 8, 128)
    loss1 = jax.block_until_ready(circle_loss(sim1, mask1, M, GAMMA))
    ref1 = circle_loss_ref(sim1, mask1, M, GAMMA)
    assert jnp.allclose(loss1, ref1, rtol=1e-5, atol=1e-5), (loss1, ref1)

    # Case 2: forced small tiles -> exercises row padding, column padding
    # (validity mask) and the multi-tile online log-sum-exp path.
    sim2, mask2 = _make_inputs(k2, 40, 300)
    loss2 = jax.block_until_ready(
        circle_loss(sim2, mask2, M, GAMMA, row_tile=32, col_tile=128))
    ref2 = circle_loss_ref(sim2, mask2, M, GAMMA)
    assert jnp.allclose(loss2, ref2, rtol=2e-5, atol=1e-5), (loss2, ref2)

    print("KERNEL_OK")
</pallas_src>

<mosaic_0001>
module attributes {stable_mosaic.version = 11 : i64} {
  func.func @_circle_loss_kernel(%arg0: i32, %arg1: i32, %arg2: memref<32x128xf32, #tpu.memory_space<vmem>>, %arg3: memref<32x128xi8, #tpu.memory_space<vmem>>, %arg4: memref<32x1xf32, #tpu.memory_space<vmem>>, %arg5: memref<32x1xf32, #tpu.memory_space<vmem>>, %arg6: memref<32x1xf32, #tpu.memory_space<vmem>>, %arg7: memref<32x1xf32, #tpu.memory_space<vmem>>, %arg8: memref<32x1xf32, #tpu.memory_space<vmem>>) attributes {dimension_semantics = [#tpu.dimension_semantics<parallel>, #tpu.dimension_semantics<arbitrary>], iteration_bounds = array<i64: 1, 1>, scalar_prefetch = 0 : i64, scratch_operands = 4 : i64, tpu.core_type = #tpu.core_type<tc>, window_params = [{transform_indices = @transform_0, window_bounds = array<i64: 32, 128>}, {transform_indices = @transform_1, window_bounds = array<i64: 32, 128>}, {transform_indices = @transform_2, window_bounds = array<i64: 32, 1>}]} {
    %c0_i32 = arith.constant 0 : i32
    %0 = arith.cmpi eq, %arg1, %c0_i32 : i32
    %1 = arith.extui %0 : i1 to i32
    %c0_i32_0 = arith.constant 0 : i32
    %2 = arith.cmpi ne, %1, %c0_i32_0 : i32
    scf.if %2 {
      %cst_43 = arith.constant -1.000000e+30 : f32
      %73 = vector.broadcast %cst_43 : f32 to vector<32x1xf32>
      %c0_44 = arith.constant 0 : index
      %c0_45 = arith.constant 0 : index
      %74 = vector.load %arg5[%c0_44, %c0_45] : memref<32x1xf32, #tpu.memory_space<vmem>>, vector<32x1xf32>
      tpu.vector_store %arg5[%c0_44, %c0_45], %73 {strides = array<i32>} : memref<32x1xf32, #tpu.memory_space<vmem>>, vector<32x1xf32>,
      %cst_46 = arith.constant -1.000000e+30 : f32
      %75 = vector.broadcast %cst_46 : f32 to vector<32x1xf32>
      %c0_47 = arith.constant 0 : index
      %c0_48 = arith.constant 0 : index
      %76 = vector.load %arg6[%c0_47, %c0_48] : memref<32x1xf32, #tpu.memory_space<vmem>>, vector<32x1xf32>
      tpu.vector_store %arg6[%c0_47, %c0_48], %75 {strides = array<i32>} : memref<32x1xf32, #tpu.memory_space<vmem>>, vector<32x1xf32>,
      %cst_49 = arith.constant 0.000000e+00 : f32
      %77 = vector.broadcast %cst_49 : f32 to vector<32x1xf32>
      %c0_50 = arith.constant 0 : index
      %c0_51 = arith.constant 0 : index
      %78 = vector.load %arg7[%c0_50, %c0_51] : memref<32x1xf32, #tpu.memory_space<vmem>>, vector<32x1xf32>
      tpu.vector_store %arg7[%c0_50, %c0_51], %77 {strides = array<i32>} : memref<32x1xf32, #tpu.memory_space<vmem>>, vector<32x1xf32>,
      %cst_52 = arith.constant 0.000000e+00 : f32
      %79 = vector.broadcast %cst_52 : f32 to vector<32x1xf32>
      %c0_53 = arith.constant 0 : index
      %c0_54 = arith.constant 0 : index
      %80 = vector.load %arg8[%c0_53, %c0_54] : memref<32x1xf32, #tpu.memory_space<vmem>>, vector<32x1xf32>
      tpu.vector_store %arg8[%c0_53, %c0_54], %79 {strides = array<i32>} : memref<32x1xf32, #tpu.memory_space<vmem>>, vector<32x1xf32>,
    } else {
    }
    %c0 = arith.constant 0 : index
    %c0_1 = arith.constant 0 : index
    %3 = vector.load %arg2[%c0, %c0_1] : memref<32x128xf32, #tpu.memory_space<vmem>>, vector<32x128xf32>
    %c0_2 = arith.constant 0 : index
    %c0_3 = arith.constant 0 : index
    %4 = vector.load %arg3[%c0_2, %c0_3] : memref<32x128xi8, #tpu.memory_space<vmem>>, vector<32x128xi8>
    %c0_i8 = arith.constant 0 : i8
    %5 = vector.broadcast %c0_i8 : i8 to vector<32x128xi8>
    %6 = arith.cmpi ne, %4, %5 : vector<32x128xi8>
    %cst = arith.constant dense<true> : vector<32x128xi1>
    %7 = arith.xori %6, %cst : vector<32x128xi1>
    %cst_4 = arith.constant 1.250000e+00 : f32
    %8 = vector.broadcast %cst_4 : f32 to vector<32x128xf32>
    %9 = arith.subf %8, %3 : vector<32x128xf32>
    %cst_5 = arith.constant 0.000000e+00 : f32
    %10 = vector.broadcast %cst_5 : f32 to vector<32x128xf32>
    %11 = arith.maximumf %9, %10 : vector<32x128xf32>
    %cst_6 = arith.constant 2.500000e-01 : f32
    %12 = vector.broadcast %cst_6 : f32 to vector<32x128xf32>
    %13 = arith.addf %3, %12 : vector<32x128xf32>
    %cst_7 = arith.constant 0.000000e+00 : f32
    %14 = vector.broadcast %cst_7 : f32 to vector<32x128xf32>
    %15 = arith.maximumf %13, %14 : vector<32x128xf32>
    %cst_8 = arith.constant 0.000000e+00 : f32
    %16 = vector.broadcast %cst_8 : f32 to vector<32x128xf32>
    %17 = arith.subf %16, %11 : vector<32x128xf32>
    %cst_9 = arith.constant 7.500000e-01 : f32
    %18 = vector.broadcast %cst_9 : f32 to vector<32x128xf32>
    %19 = arith.subf %3, %18 : vector<32x128xf32>
    %20 = arith.mulf %17, %19 : vector<32x128xf32>
    %cst_10 = arith.constant 6.400000e+01 : f32
    %21 = vector.broadcast %cst_10 : f32 to vector<32x128xf32>
    %22 = arith.mulf %20, %21 : vector<32x128xf32>
    %cst_11 = arith.constant 2.500000e-01 : f32
    %23 = vector.broadcast %cst_11 : f32 to vector<32x128xf32>
    %24 = arith.subf %3, %23 : vector<32x128xf32>
    %25 = arith.mulf %15, %24 : vector<32x128xf32>
    %cst_12 = arith.constant 6.400000e+01 : f32
    %26 = vector.broadcast %cst_12 : f32 to vector<32x128xf32>
    %27 = arith.mulf %25, %26 : vector<32x128xf32>
    %cst_13 = arith.constant -1.000000e+30 : f32
    %28 = vector.broadcast %cst_13 : f32 to vector<32x128xf32>
    %29 = arith.select %6, %22, %28 : vector<32x128xi1>, vector<32x128xf32>
    %cst_14 = arith.constant dense<0xFF800000> : vector<32xf32>
    %30 = vector.multi_reduction <maximumf>, %29, %cst_14 [1] : vector<32x128xf32> to vector<32xf32>
    %31 = vector.shape_cast %30 : vector<32xf32> to vector<32x1xf32>
    %cst_15 = arith.constant -1.000000e+30 : f32
    %32 = vector.broadcast %cst_15 : f32 to vector<32x128xf32>
    %33 = arith.select %7, %27, %32 : vector<32x128xi1>, vector<32x128xf32>
    %cst_16 = arith.constant dense<0xFF800000> : vector<32xf32>
    %34 = vector.multi_reduction <maximumf>, %33, %cst_16 [1] : vector<32x128xf32> to vector<32xf32>
    %35 = vector.shape_cast %34 : vector<32xf32> to vector<32x1xf32>
    %c0_17 = arith.constant 0 : index
    %c0_18 = arith.constant 0 : index
    %36 = vector.load %arg5[%c0_17, %c0_18] : memref<32x1xf32, #tpu.memory_space<vmem>>, vector<32x1xf32>
    %37 = arith.maximumf %36, %31 : vector<32x1xf32>
    %c0_19 = arith.constant 0 : index
    %c0_20 = arith.constant 0 : index
    %38 = vector.load %arg6[%c0_19, %c0_20] : memref<32x1xf32, #tpu.memory_space<vmem>>, vector<32x1xf32>
    %39 = arith.maximumf %38, %35 : vector<32x1xf32>
    %40 = vector.broadcast %37 : vector<32x1xf32> to vector<32x128xf32>
    %41 = arith.subf %22, %40 : vector<32x128xf32>
    %42 = vector.broadcast %39 : vector<32x1xf32> to vector<32x128xf32>
    %43 = arith.subf %27, %42 : vector<32x128xf32>
    %44 = arith.select %6, %41, %43 : vector<32x128xi1>, vector<32x128xf32>
    %45 = math.exp %44 : vector<32x128xf32>
    %cst_21 = arith.constant 0.000000e+00 : f32
    %46 = vector.broadcast %cst_21 : f32 to vector<32x128xf32>
    %47 = arith.select %6, %45, %46 : vector<32x128xi1>, vector<32x128xf32>
    %cst_22 = arith.constant dense<0.000000e+00> : vector<32xf32>
    %48 = vector.multi_reduction <add>, %47, %cst_22 [1] : vector<32x128xf32> to vector<32xf32>
    %49 = vector.shape_cast %48 : vector<32xf32> to vector<32x1xf32>
    %cst_23 = arith.constant 0.000000e+00 : f32
    %50 = vector.broadcast %cst_23 : f32 to vector<32x128xf32>
    %51 = arith.select %7, %45, %50 : vector<32x128xi1>, vector<32x128xf32>
    %cst_24 = arith.constant dense<0.000000e+00> : vector<32xf32>
    %52 = vector.multi_reduction <add>, %51, %cst_24 [1] : vector<32x128xf32> to vector<32xf32>
    %53 = vector.shape_cast %52 : vector<32xf32> to vector<32x1xf32>
    %c0_25 = arith.constant 0 : index
    %c0_26 = arith.constant 0 : index
    %54 = vector.load %arg7[%c0_25, %c0_26] : memref<32x1xf32, #tpu.memory_space<vmem>>, vector<32x1xf32>
    %c0_27 = arith.constant 0 : index
    %c0_28 = arith.constant 0 : index
    %55 = vector.load %arg5[%c0_27, %c0_28] : memref<32x1xf32, #tpu.memory_space<vmem>>, vector<32x1xf32>
    %56 = arith.subf %55, %37 : vector<32x1xf32>
    %57 = math.exp %56 : vector<32x1xf32>
    %58 = arith.mulf %54, %57 : vector<32x1xf32>
    %59 = arith.addf %58, %49 : vector<32x1xf32>
    %c0_29 = arith.constant 0 : index
    %c0_30 = arith.constant 0 : index
    %60 = vector.load %arg7[%c0_29, %c0_30] : memref<32x1xf32, #tpu.memory_space<vmem>>, vector<32x1xf32>
    tpu.vector_store %arg7[%c0_29, %c0_30], %59 {strides = array<i32>} : memref<32x1xf32, #tpu.memory_space<vmem>>, vector<32x1xf32>,
    %c0_31 = arith.constant 0 : index
    %c0_32 = arith.constant 0 : index
    %61 = vector.load %arg8[%c0_31, %c0_32] : memref<32x1xf32, #tpu.memory_space<vmem>>, vector<32x1xf32>
    %c0_33 = arith.constant 0 : index
    %c0_34 = arith.constant 0 : index
    %62 = vector.load %arg6[%c0_33, %c0_34] : memref<32x1xf32, #tpu.memory_space<vmem>>, vector<32x1xf32>
    %63 = arith.subf %62, %39 : vector<32x1xf32>
    %64 = math.exp %63 : vector<32x1xf32>
    %65 = arith.mulf %61, %64 : vector<32x1xf32>
    %66 = arith.addf %65, %53 : vector<32x1xf32>
    %c0_35 = arith.constant 0 : index
    %c0_36 = arith.constant 0 : index
    %67 = vector.load %arg8[%c0_35, %c0_36] : memref<32x1xf32, #tpu.memory_space<vmem>>, vector<32x1xf32>
    tpu.vector_store %arg8[%c0_35, %c0_36], %66 {strides = array<i32>} : memref<32x1xf32, #tpu.memory_space<vmem>>, vector<32x1xf32>,
    %c0_37 = arith.constant 0 : index
    %c0_38 = arith.constant 0 : index
    %68 = vector.load %arg5[%c0_37, %c0_38] : memref<32x1xf32, #tpu.memory_space<vmem>>, vector<32x1xf32>
    tpu.vector_store %arg5[%c0_37, %c0_38], %37 {strides = array<i32>} : memref<32x1xf32, #tpu.memory_space<vmem>>, vector<32x1xf32>,
    %c0_39 = arith.constant 0 : index
    %c0_40 = arith.constant 0 : index
    %69 = vector.load %arg6[%c0_39, %c0_40] : memref<32x1xf32, #tpu.memory_space<vmem>>, vector<32x1xf32>
    tpu.vector_store %arg6[%c0_39, %c0_40], %39 {strides = array<i32>} : memref<32x1xf32, #tpu.memory_space<vmem>>, vector<32x1xf32>,
    %c0_i32_41 = arith.constant 0 : i32
    %70 = arith.cmpi eq, %arg1, %c0_i32_41 : i32
    %71 = arith.extui %70 : i1 to i32
    %c0_i32_42 = arith.constant 0 : i32
    %72 = arith.cmpi ne, %71, %c0_i32_42 : i32
    scf.if %72 {
      %c0_43 = arith.constant 0 : index
      %c0_44 = arith.constant 0 : index
      %73 = vector.load %arg5[%c0_43, %c0_44] : memref<32x1xf32, #tpu.memory_space<vmem>>, vector<32x1xf32>
      %c0_45 = arith.constant 0 : index
      %c0_46 = arith.constant 0 : index
      %74 = vector.load %arg7[%c0_45, %c0_46] : memref<32x1xf32, #tpu.memory_space<vmem>>, vector<32x1xf32>
      %75 = math.log %74 : vector<32x1xf32>
      %76 = arith.addf %73, %75 : vector<32x1xf32>
      %c0_47 = arith.constant 0 : index
      %c0_48 = arith.constant 0 : index
      %77 = vector.load %arg6[%c0_47, %c0_48] : memref<32x1xf32, #tpu.memory_space<vmem>>, vector<32x1xf32>
      %78 = arith.addf %76, %77 : vector<32x1xf32>
      %c0_49 = arith.constant 0 : index
      %c0_50 = arith.constant 0 : index
      %79 = vector.load %arg8[%c0_49, %c0_50] : memref<32x1xf32, #tpu.memory_space<vmem>>, vector<32x1xf32>
      %80 = math.log %79 : vector<32x1xf32>
      %81 = arith.addf %78, %80 : vector<32x1xf32>
      %cst_51 = arith.constant 0.000000e+00 : f32
      %82 = vector.broadcast %cst_51 : f32 to vector<32x1xf32>
      %83 = arith.maximumf %81, %82 : vector<32x1xf32>
      %84 = math.absf %81 : vector<32x1xf32>
      %cst_52 = arith.constant 0.000000e+00 : f32
      %85 = vector.broadcast %cst_52 : f32 to vector<32x1xf32>
      %86 = arith.subf %85, %84 : vector<32x1xf32>
      %87 = math.exp %86 : vector<32x1xf32>
      %88 = math.log1p %87 : vector<32x1xf32>
      %89 = arith.addf %83, %88 : vector<32x1xf32>
      %c0_53 = arith.constant 0 : index
      %c0_54 = arith.constant 0 : index
      %90 = vector.load %arg4[%c0_53, %c0_54] : memref<32x1xf32, #tpu.memory_space<vmem>>, vector<32x1xf32>
      tpu.vector_store %arg4[%c0_53, %c0_54], %89 {strides = array<i32>} : memref<32x1xf32, #tpu.memory_space<vmem>>, vector<32x1xf32>,
    } else {
    }
    return
  }
  func.func @transform_0(%arg0: i32, %arg1: i32) -> (i32, i32) {
    %c0_i32 = arith.constant 0 : i32
    return %arg0, %arg1 : i32, i32
  }
  func.func @transform_1(%arg0: i32, %arg1: i32) -> (i32, i32) {
    %c0_i32 = arith.constant 0 : i32
    return %arg0, %arg1 : i32, i32
  }
  func.func @transform_2(%arg0: i32, %arg1: i32) -> (i32, i32) {
    %c0_i32 = arith.constant 0 : i32
    %c0_i32_0 = arith.constant 0 : i32
    return %arg0, %c0_i32 : i32, i32
  }
}

</mosaic_0001>

<bundles_post_ra>
// kernel: tpu_custom_call.1
= control target key start
LH: loop header
LB: loop body
LE: loop exit
PB: predicated region body
PF: predicated region fallthrough
CT: control target
= control target key end

     0   :  { %7 = vsyncpa [#allocation7], 0  ;;  %s944_s0 = inlined_call_operand.hbm [shape: f32[32,128], index: 0, kind: input, shape index: {}]   ;;  %s945_s1 = inlined_call_operand.hbm [shape: s8[32,128], index: 1, kind: input, shape index: {}]   ;;  %s946_s2 = inlined_call_operand.vmem [shape: f32[32,1], index: 2, kind: output, shape index: {}]  }
   0x1   :  { %8 = vsyncpa [#allocation9], 0  ;;  %s601_s9 = smov [#allocation6]   ;;  %s553_s13 = scalar_lea.hbm %s944_s0, 512 }
   0x2   :  { %s14_s10 = sshll.u32 %s601_s9, 4  ;;  %p554_p0 = scmp.ne.s32.totalorder %s944_s0, %s553_s13  ;;  %s15_s10 = int_to_ptr.vmem [resolvable:$true] %s14_s10 }
   0x3   :  { %p557_p1 = scmp.lt.u32.totalorder %s553_s13, %s944_s0 }
   0x5   :  { %p559_p2 = pnand %p557_p1, %p554_p0 }
   0x7   :  { %562 = shalt.err (!%p559_p2)
}
   0x8   :  { %s563_s18 = scalar_lea.vmem %s15_s10, 512  ;;  %p568_p4 = scmp.lt.s32.totalorder %s15_s10, %s15_s10 }
   0x9   :  { %p564_p3 = scmp.ne.s32.totalorder %s15_s10, %s563_s18  ;;  %p569_p5 = scmp.lt.s32.totalorder %s563_s18, %s563_s18 }
   0xb   :  { %p570_p6 = por %p569_p5, %p568_p4 }
   0xd   :  { %p571_p7 = pnand %p570_p6, %p564_p3 }
   0xf   :  { %574 = shalt.err (!%p571_p7)
}
  0x10   :  { %s602_s19 = smov 128   ;;  %s603_s20 = smov 8  }
  0x11   :  { %20 = dma.hbm_to_vmem [thread:$0]  %s944_s0, 512, %s15_s10, [#allocation7], %s602_s19, %s602_s19, %s603_s20  }
  0x12   :  { %s604_s23 = smov [#allocation8]   ;;  %s575_s27 = scalar_lea.hbm %s945_s1, 128 }
  0x13   :  { %s27_s24 = sshll.u32 %s604_s23, 4  ;;  %p576_p8 = scmp.ne.s32.totalorder %s945_s1, %s575_s27  ;;  %s28_s24 = int_to_ptr.vmem [resolvable:$true] %s27_s24 }
  0x14   :  { %p579_p9 = scmp.lt.u32.totalorder %s575_s27, %s945_s1 }
  0x16   :  { %p581_p10 = pnand %p579_p9, %p576_p8 }
  0x18   :  { %584 = shalt.err (!%p581_p10)
}
  0x19   :  { %s585_s4 = scalar_lea.vmem %s28_s24, 128  ;;  %p590_p12 = scmp.lt.s32.totalorder %s28_s24, %s28_s24 }
  0x1a   :  { %p586_p11 = scmp.ne.s32.totalorder %s28_s24, %s585_s4  ;;  %p591_p13 = scmp.lt.s32.totalorder %s585_s4, %s585_s4 }
  0x1c   :  { %p592_p0 = por %p591_p13, %p590_p12 }
  0x1e   :  { %p593_p1 = pnand %p592_p0, %p586_p11 }
  0x20   :  { %596 = shalt.err (!%p593_p1)
}
  0x21   :  { %30 = dma.hbm_to_vmem [thread:$0]  %s945_s1, 128, %s28_s24, [#allocation9]  }
  0x22   :  { %597 = dma.done.wait [#allocation7], 512  }
  0x23   :  { %598 = vsyncadd [#allocation7], 4294966784 }
  0x24   :  { %599 = dma.done.wait [#allocation9], 128  }
  0x25   :  { %600 = vsyncadd [#allocation9], 4294967168  ;;  %vm43_vm0 = vcmask 7168   ;;  %v605_v0 = vmov 0   ;;  %v606_v1 = vmov -1e+30  }
  0x26   :  { %495 = vset.pattern.permute.xlu0 %v605_v0  ;;  %496 = vset.pattern.permute.xlu1 %v605_v0  ;;  %44 = vst.msk [vmem:[#allocation2] sm:$0xff] %vm43_vm0, %v606_v1  ;;  %45 = vst.msk [vmem:[#allocation2 + $0x8] sm:$0xff] %vm43_vm0, %v606_v1  ;;  %v60_v2 = vld [vmem:[#allocation6] sm:$0xff]  ;;  %v658_v4 = vld [vmem:[#allocation6 + $0x8] sm:$0xff]  ;;  %vm607_vm5 = vmmov 1  }
  0x27   :  { %46 = vst.msk [vmem:[#allocation2 + $0x10] sm:$0xff] %vm43_vm0, %v606_v1  ;;  %47 = vst.msk [vmem:[#allocation2 + $0x18] sm:$0xff] %vm43_vm0, %v606_v1  ;;  %v64_v3 = vld [vmem:[#allocation8] sm:$0xff]  ;;  %v67_v5 = vsub.f32 1.25, %v60_v2  ;;  %v479_v6 = vadd.f32 -0.75, %v60_v2  ;;  %v68_v7 = vsub.f32 1.25, %v658_v4 }
  0x28   :  { %48 = vst.msk [vmem:[#allocation3] sm:$0xff] %vm43_vm0, %v606_v1  ;;  %49 = vst.msk [vmem:[#allocation3 + $0x8] sm:$0xff] %vm43_vm0, %v606_v1  ;;  %vm65_vm1 = vnez %v64_v3  ;;  %v661_v8 = vld [vmem:[#allocation6 + $0x10] sm:$0xff]  ;;  %v663_v9 = vld [vmem:[#allocation6 + $0x18] sm:$0xff]  ;;  %v480_v11 = vadd.f32 -0.75, %v658_v4  ;;  %v75_v49 = vadd.f32 0.25, %v60_v2 }
  0x29   :  { %50 = vst.msk [vmem:[#allocation3 + $0x10] sm:$0xff] %vm43_vm0, %v606_v1  ;;  %51 = vst.msk [vmem:[#allocation3 + $0x18] sm:$0xff] %vm43_vm0, %v606_v1  ;;  %v111_v10 = vsel %vm65_vm1, 16843009, %v605_v0  ;;  %v69_v12 = vsub.f32 1.25, %v661_v8  ;;  %v481_v13 = vadd.f32 -0.75, %v661_v8 }
  0x2a   :  { %v71_v14 = vmax.f32 %v67_v5, 0.0  ;;  %v112_v15 = vunpack.c.0.s8 %v111_v10  ;;  %v72_v16 = vmax.f32 %v68_v7, 0.0  ;;  %v113_v17 = vunpack.c.1.s8 %v111_v10  ;;  %vm66_vm6 = vmxor %vm65_vm1, %vm607_vm5 }
  0x2b   :  { %v73_v18 = vmax.f32 %v69_v12, 0.0  ;;  %v114_v19 = vunpack.c.2.s8 %v111_v10  ;;  %v70_v20 = vsub.f32 1.25, %v663_v9  ;;  %v482_v21 = vadd.f32 -0.75, %v663_v9 }
  0x2c   :  { %v83_v22 = vsub.f32 0.0, %v71_v14  ;;  %v116_v23 = vpack.c.b16 %v112_v15, %v112_v15  ;;  %v84_v24 = vsub.f32 0.0, %v72_v16  ;;  %v118_v25 = vpack.c.b16 %v113_v17, %v113_v17 }
  0x2d   :  { %v85_v26 = vsub.f32 0.0, %v73_v18  ;;  %v120_v27 = vpack.c.b16 %v114_v19, %v114_v19  ;;  %v74_v28 = vmax.f32 %v70_v20, 0.0  ;;  %v115_v29 = vunpack.c.3.s8 %v111_v10 }
  0x2e   :  { %v91_v30 = vmul.f32 %v479_v6, %v83_v22  ;;  %v117_v31 = vpack.c.b8 %v116_v23, %v116_v23  ;;  %v92_v32 = vmul.f32 %v480_v11, %v84_v24  ;;  %v119_v33 = vpack.c.b8 %v118_v25, %v118_v25 }
  0x2f   :  { %v93_v34 = vmul.f32 %v481_v13, %v85_v26  ;;  %v121_v35 = vpack.c.b8 %v120_v27, %v120_v27  ;;  %v86_v36 = vsub.f32 0.0, %v74_v28  ;;  %v122_v37 = vpack.c.b16 %v115_v29, %v115_v29 }
  0x30   :  { %v672_v38 = vmul.f32 64.0, %v91_v30  ;;  %vm124_vm2 = vnez %v117_v31  ;;  %v674_v39 = vmul.f32 64.0, %v92_v32  ;;  %vm125_vm3 = vnez %v119_v33 }
  0x31   :  { %v128_v40 = vsel %vm124_vm2, 16843009, %v605_v0  ;;  %v129_v41 = vsel %vm125_vm3, 16843009, %v605_v0  ;;  %v678_v42 = vmul.f32 64.0, %v93_v34  ;;  %vm126_vm4 = vnez %v121_v35 }
  0x32   :  { %v132_v43 = vunpack.c.0.s8 %v128_v40  ;;  %v133_v44 = vunpack.c.0.s8 %v129_v41  ;;  %v130_v45 = vsel %vm126_vm4, 16843009, %v605_v0  ;;  %v94_v46 = vmul.f32 %v482_v21, %v86_v36 }
  0x33   :  { %v134_v47 = vunpack.c.0.s8 %v130_v45  ;;  %v123_v48 = vpack.c.b8 %v122_v37, %v122_v37  ;;  %v483_v50 = vadd.f32 -0.25, %v60_v2  ;;  %v152_v54 = vsel %vm66_vm6, 16843009, %v605_v0 }
  0x34   :  { %vm682_vm7 = vcmp.ne.s32.totalorder %v132_v43, 0  ;;  %vm686_vm8 = vcmp.ne.s32.totalorder %v133_v44, 0  ;;  %v690_v53 = vmul.f32 64.0, %v94_v46  ;;  %v79_v60 = vmax.f32 %v75_v49, 0.0 }
  0x35   :  { %v140_v55 = vsel %vm682_vm7, %v672_v38, -1e+30  ;;  %v141_v56 = vsel %vm686_vm8, %v674_v39, -1e+30  ;;  %vm699_vm9 = vcmp.ne.s32.totalorder %v134_v47, 0  ;;  %vm127_vm10 = vnez %v123_v48 }
  0x36   :  { %144 = vmax.xlane.f32.xlu0 %v140_v55  ;;  %v142_v58 = vsel %vm699_vm9, %v678_v42, -1e+30  ;;  %v131_v59 = vsel %vm127_vm10, 16843009, %v605_v0  ;;  %v153_v61 = vunpack.c.0.s8 %v152_v54  ;;  %v76_v63 = vadd.f32 0.25, %v658_v4 }
  0x37   :  { %148 = vmax.xlane.f32.xlu1 %v142_v58  ;;  %v135_v62 = vunpack.c.0.s8 %v131_v59  ;;  %v484_v1 = vadd.f32 -0.25, %v658_v4  ;;  %v154_v2 = vunpack.c.1.s8 %v152_v54  ;;  %v103_v3 = vmul.f32 %v483_v50, %v79_v60  ;;  %v770_v50 = vld [vmem:[#allocation2 + $0x10] sm:$0xff]  ;;  %v775_v58 = vld [vmem:[#allocation2 + $0x8] sm:$0xff] }
  0x38   :  { %v157_v5 = vpack.c.b16 %v153_v61, %v153_v61  ;;  %v77_v6 = vadd.f32 0.25, %v661_v8  ;;  %v485_v7 = vadd.f32 -0.25, %v661_v8  ;;  %v80_v11 = vmax.f32 %v76_v63, 0.0  ;;  %v785_v61 = vld [vmem:[#allocation2 + $0x18] sm:$0xff] }
  0x39   :  { %vm711_vm11 = vcmp.ne.s32.totalorder %v135_v62, 0  ;;  %v159_v12 = vpack.c.b16 %v154_v2, %v154_v2  ;;  %v155_v13 = vunpack.c.2.s8 %v152_v54  ;;  %v78_v8 = vadd.f32 0.25, %v663_v9 }
  0x3a   :  { %146 = vmax.xlane.f32.xlu0 %v141_v56  ;;  %v143_v14 = vsel %vm711_vm11, %v690_v53, -1e+30  ;;  %v158_v4 = vpack.c.b8 %v157_v5, %v157_v5  ;;  %v81_v15 = vmax.f32 %v77_v6, 0.0  ;;  %v104_v16 = vmul.f32 %v484_v1, %v80_v11  ;;  %v809_v11 = vld [vmem:[#allocation3 + $0x8] sm:$0xff] }
  0x3b   :  { %150 = vmax.xlane.f32.xlu1 %v143_v14  ;;  %v160_v17 = vpack.c.b8 %v159_v12, %v159_v12  ;;  %v161_v18 = vpack.c.b16 %v155_v13, %v155_v13  ;;  %v486_v20 = vadd.f32 -0.25, %v663_v9  ;;  %v156_v21 = vunpack.c.3.s8 %v152_v54 }
  0x3c   :  { %vm165_vm12 = vnez %v158_v4  ;;  %v105_v19 = vmul.f32 %v485_v7, %v81_v15  ;;  %v720_v22 = vmul.f32 64.0, %v103_v3  ;;  %v723_v26 = vmul.f32 64.0, %v104_v16  ;;  %v806_v7 = vld [vmem:[#allocation3] sm:$0xff]  ;;  %v817_v15 = vld [vmem:[#allocation3 + $0x10] sm:$0xff] }
  0x3d   :  { %v169_v23 = vsel %vm165_vm12, 16843009, %v605_v0  ;;  %vm166_vm13 = vnez %v160_v17  ;;  %v162_v24 = vpack.c.b8 %v161_v18, %v161_v18  ;;  %v82_v28 = vmax.f32 %v78_v8, 0.0 }
  0x3e   :  { %v173_v25 = vunpack.c.0.s8 %v169_v23  ;;  %v170_v27 = vsel %vm166_vm13, 16843009, %v605_v0  ;;  %v163_v30 = vpack.c.b16 %v156_v21, %v156_v21  ;;  %v730_v9 = vmul.f32 64.0, %v105_v19  ;;  %v831_v19 = vld [vmem:[#allocation3 + $0x18] sm:$0xff] }
  0x3f   :  { %v174_v29 = vunpack.c.0.s8 %v170_v27  ;;  %vm167_vm14 = vnez %v162_v24  ;;  %v106_v33 = vmul.f32 %v486_v20, %v82_v28  ;;  %v608_v49 = vmov 0.0  }
  0x40   :  { %vm726_vm15 = vcmp.ne.s32.totalorder %v173_v25, 0  ;;  %v171_v32 = vsel %vm167_vm14, 16843009, %v605_v0  ;;  %v164_v37 = vpack.c.b8 %v163_v30, %v163_v30  ;;  %52 = vst.msk [vmem:[#allocation4] sm:$0xff] %vm43_vm0, %v608_v49  ;;  %53 = vst.msk [vmem:[#allocation4 + $0x8] sm:$0xff] %vm43_vm0, %v608_v49 }
  0x41   :  { %v181_v34 = vsel %vm726_vm15, %v720_v22, -1e+30  ;;  %vm736_vm1 = vcmp.ne.s32.totalorder %v174_v29, 0  ;;  %v175_v36 = vunpack.c.0.s8 %v171_v32  ;;  %v750_v44 = vmul.f32 64.0, %v106_v33  ;;  %54 = vst.msk [vmem:[#allocation4 + $0x10] sm:$0xff] %vm43_vm0, %v608_v49  ;;  %55 = vst.msk [vmem:[#allocation4 + $0x18] sm:$0xff] %vm43_vm0, %v608_v49 }
  0x42   :  { %185 = vmax.xlane.f32.xlu0 %v181_v34  ;;  %v182_v40 = vsel %vm736_vm1, %v723_v26, -1e+30  ;;  %vm168_vm3 = vnez %v164_v37  ;;  %56 = vst.msk [vmem:[#allocation5] sm:$0xff] %vm43_vm0, %v608_v49  ;;  %57 = vst.msk [vmem:[#allocation5 + $0x8] sm:$0xff] %vm43_vm0, %v608_v49 }
  0x43   :  { %187 = vmax.xlane.f32.xlu1 %v182_v40  ;;  %vm743_vm2 = vcmp.ne.s32.totalorder %v175_v36, 0  ;;  %v172_v45 = vsel %vm168_vm3, 16843009, %v605_v0  ;;  %58 = vst.msk [vmem:[#allocation5 + $0x10] sm:$0xff] %vm43_vm0, %v608_v49  ;;  %59 = vst.msk [vmem:[#allocation5 + $0x18] sm:$0xff] %vm43_vm0, %v608_v49  ;;  %v768_v0 = vld [vmem:[#allocation2] sm:$0xff] }
  0x44   :  { %v183_v43 = vsel %vm743_vm2, %v730_v9, -1e+30  ;;  %v176_v46 = vunpack.c.0.s8 %v172_v45 }
  0x46   :  { %189 = vmax.xlane.f32.xlu0 %v183_v43  ;;  %vm753_vm4 = vcmp.ne.s32.totalorder %v176_v46, 0 }
  0x47   :  { %v184_v48 = vsel %vm753_vm4, %v750_v44, -1e+30 }
  0x48   :  { %191 = vmax.xlane.f32.xlu1 %v184_v48 }
  0xc3   :  { %v145_v54 = vpop.xlane.xlu0 %144 }
  0xc4   :  { %v773_v55 = vmax.f32 %v768_v0, %v145_v54  ;;  %v149_v56 = vpop.xlane.xlu1 %148 }
  0xc5   :  { %v778_v59 = vmax.f32 %v770_v50, %v149_v56 }
  0xc6   :  { %v297_v60 = vsub.f32 %v768_v0, %v773_v55  ;;  %354 = vst.msk [vmem:[#allocation2] sm:$0xff] %vm43_vm0, %v773_v55  ;;  %211 = vperm.xlu0 %495, %v773_v55   ;;  %v293_v55 = vld [vmem:[#allocation4] sm:$0xff] }
  0xc7   :  { %v147_v62 = vpop.xlane.xlu0 %146  ;;  %v299_v63 = vsub.f32 %v770_v50, %v778_v59  ;;  %356 = vst.msk [vmem:[#allocation2 + $0x10] sm:$0xff] %vm43_vm0, %v778_v59 }
  0xc8   :  { %v792_v1 = vmax.f32 %v775_v58, %v147_v62  ;;  %v151_v2 = vpop.xlane.xlu1 %150  ;;  %v301_v31 = vmul.f32 1.442695, %v297_v60 }
  0xc9   :  { %v795_v3 = vmax.f32 %v785_v61, %v151_v2  ;;  %v305_v35 = vmul.f32 1.442695, %v299_v63  ;;  %v294_v63 = vld [vmem:[#allocation4 + $0x8] sm:$0xff] }
  0xca   :  { %v298_v5 = vsub.f32 %v775_v58, %v792_v1  ;;  %355 = vst.msk [vmem:[#allocation2 + $0x8] sm:$0xff] %vm43_vm0, %v792_v1  ;;  %216 = vperm.xlu1 %496, %v792_v1  }
  0xcb   :  { %v300_v6 = vsub.f32 %v785_v61, %v795_v3  ;;  %357 = vst.msk [vmem:[#allocation2 + $0x18] sm:$0xff] %vm43_vm0, %v795_v3 }
  0xcc   :  { %v303_v10 = vmul.f32 1.442695, %v298_v5 }
  0xcd   :  { %v307_v41 = vmul.f32 1.442695, %v300_v6 }
  0xce   :  { %221 = vperm.xlu1 %496, %v778_v59  }
  0xcf   :  { %v186_v12 = vpop.xlane.xlu0 %185 }
  0xd0   :  { %v812_v13 = vmax.f32 %v806_v7, %v186_v12  ;;  %v188_v14 = vpop.xlane.xlu1 %187 }
  0xd1   :  { %v815_v4 = vmax.f32 %v809_v11, %v188_v14 }
  0xd2   :  { %226 = vperm.xlu1 %496, %v795_v3   ;;  %v330_v16 = vsub.f32 %v806_v7, %v812_v13  ;;  %358 = vst.msk [vmem:[#allocation3] sm:$0xff] %vm43_vm0, %v812_v13 }
  0xd3   :  { %v331_v17 = vsub.f32 %v809_v11, %v815_v4  ;;  %359 = vst.msk [vmem:[#allocation3 + $0x8] sm:$0xff] %vm43_vm0, %v815_v4  ;;  %v190_v18 = vpop.xlane.xlu0 %189  ;;  %v295_v11 = vld [vmem:[#allocation4 + $0x10] sm:$0xff] }
  0xd4   :  { %v829_v8 = vmax.f32 %v817_v15, %v190_v18  ;;  %v334_v47 = vmul.f32 1.442695, %v330_v16 }
  0xd5   :  { %v192_v21 = vpop.xlane.xlu1 %191  ;;  %v336_v58 = vmul.f32 1.442695, %v331_v17 }
  0xd6   :  { %235 = vperm.xlu1 %496, %v812_v13   ;;  %v332_v20 = vsub.f32 %v817_v15, %v829_v8  ;;  %360 = vst.msk [vmem:[#allocation3 + $0x10] sm:$0xff] %vm43_vm0, %v829_v8  ;;  %v839_v23 = vmax.f32 %v831_v19, %v192_v21 }
  0xd8   :  { %v333_v24 = vsub.f32 %v831_v19, %v839_v23  ;;  %361 = vst.msk [vmem:[#allocation3 + $0x18] sm:$0xff] %vm43_vm0, %v839_v23  ;;  %v338_v50 = vmul.f32 1.442695, %v332_v20  ;;  %v322_v20 = vld [vmem:[#allocation5] sm:$0xff] }
  0xda   :  { %240 = vperm.xlu1 %496, %v815_v4   ;;  %v340_v3 = vmul.f32 1.442695, %v333_v24 }
  0xde   :  { %245 = vperm.xlu1 %496, %v829_v8   ;;  %v296_v8 = vld [vmem:[#allocation4 + $0x18] sm:$0xff] }
  0xe2   :  { %250 = vperm.xlu1 %496, %v839_v23  }
 0x145   :  { %v212_v29 = vpop.permute.xlu0 %211 }
 0x146   :  { %v229_v32 = vsub.f32 %v672_v38, %v212_v29 }
 0x149   :  { %v217_v25 = vpop.permute.xlu1 %216 }
 0x14a   :  { %v230_v40 = vsub.f32 %v674_v39, %v217_v25 }
 0x14d   :  { %v222_v27 = vpop.permute.xlu1 %221 }
 0x14e   :  { %v231_v49 = vsub.f32 %v678_v42, %v222_v27 }
 0x151   :  { %v227_v28 = vpop.permute.xlu1 %226 }
 0x152   :  { %v232_v39 = vsub.f32 %v690_v53, %v227_v28 }
 0x155   :  { %v236_v30 = vpop.permute.xlu1 %235 }
 0x156   :  { %v253_v33 = vsub.f32 %v720_v22, %v236_v30 }
 0x158   :  { %v257_v34 = vsel %vm682_vm7, %v229_v32, %v253_v33  ;;  %v323_v33 = vld [vmem:[#allocation5 + $0x8] sm:$0xff] }
 0x159   :  { %v261_v36 = vmul.f32 1.442695, %v257_v34  ;;  %v241_v37 = vpop.permute.xlu1 %240  ;;  %v324_v34 = vld [vmem:[#allocation5 + $0x10] sm:$0xff] }
 0x15a   :  { %v254_v43 = vsub.f32 %v723_v26, %v241_v37 }
 0x15b   :  { %497 = vpow2.f32 %v261_v36 }
 0x15c   :  { %v258_v45 = vsel %vm686_vm8, %v230_v40, %v254_v43 }
 0x15d   :  { %v263_v46 = vmul.f32 1.442695, %v258_v45  ;;  %v246_v48 = vpop.permute.xlu1 %245 }
 0x15e   :  { %v255_v38 = vsub.f32 %v730_v9, %v246_v48 }
 0x15f   :  { %499 = vpow2.f32 %v263_v46 }
 0x160   :  { %v259_v22 = vsel %vm699_vm9, %v231_v49, %v255_v38  ;;  %v325_v38 = vld [vmem:[#allocation5 + $0x18] sm:$0xff] }
 0x161   :  { %v265_v54 = vmul.f32 1.442695, %v259_v22  ;;  %v251_v56 = vpop.permute.xlu1 %250 }
 0x162   :  { %v256_v26 = vsub.f32 %v750_v44, %v251_v56 }
 0x163   :  { %501 = vpow2.f32 %v265_v54 }
 0x164   :  { %v260_v62 = vsel %vm711_vm11, %v232_v39, %v256_v26 }
 0x165   :  { %v498_v2 = vpop.eup %497  ;;  %v267_v12 = vmul.f32 1.442695, %v260_v62 }
 0x166   :  { %v269_v42 = vsel %vm682_vm7, %v498_v2, 0.0  ;;  %v281_v21 = vsel %vm726_vm15, %v498_v2, 0.0 }
 0x167   :  { %503 = vpow2.f32 %v267_v12  ;;  %273 = vadd.xlane.f32.xlu1 %v269_v42 }
 0x168   :  { %505 = vpow2.f32 %v301_v31 }
 0x169   :  { %v500_v9 = vpop.eup %499  ;;  %507 = vpow2.f32 %v303_v10  ;;  %v366_v10 = vld [vmem:[#allocation2 + $0x8] sm:$0xff] }
 0x16a   :  { %v270_v14 = vsel %vm686_vm8, %v500_v9, 0.0  ;;  %v282_v52 = vsel %vm736_vm1, %v500_v9, 0.0  ;;  %509 = vpow2.f32 %v305_v35 }
 0x16b   :  { %275 = vadd.xlane.f32.xlu0 %v270_v14  ;;  %511 = vpow2.f32 %v307_v41  ;;  %v367_v41 = vld [vmem:[#allocation2 + $0x10] sm:$0xff] }
 0x16c   :  { %513 = vpow2.f32 %v334_v47  ;;  %v385_v47 = vld [vmem:[#allocation3] sm:$0xff] }
 0x16d   :  { %v502_v18 = vpop.eup %501  ;;  %515 = vpow2.f32 %v336_v58 }
 0x16e   :  { %v271_v53 = vsel %vm699_vm9, %v502_v18, 0.0  ;;  %v283_v25 = vsel %vm743_vm2, %v502_v18, 0.0  ;;  %517 = vpow2.f32 %v338_v50 }
 0x16f   :  { %277 = vadd.xlane.f32.xlu0 %v271_v53  ;;  %519 = vpow2.f32 %v340_v3 }
 0x171   :  { %v504_v44 = vpop.eup %503 }
 0x172   :  { %v272_v51 = vsel %vm711_vm11, %v504_v44, 0.0  ;;  %v284_v57 = vsel %vm753_vm4, %v504_v44, 0.0  ;;  %v506_v0 = vpop.eup %505 }
 0x173   :  { %285 = vadd.xlane.f32.xlu0 %v281_v21  ;;  %279 = vadd.xlane.f32.xlu1 %v272_v51  ;;  %v309_v59 = vmul.f32 %v506_v0, %v293_v55  ;;  %v508_v60 = vpop.eup %507  ;;  %v365_v21 = vld [vmem:[#allocation2] sm:$0xff] }
 0x174   :  { %v310_v5 = vmul.f32 %v508_v60, %v294_v63  ;;  %v510_v6 = vpop.eup %509  ;;  %v386_v63 = vld [vmem:[#allocation3 + $0x8] sm:$0xff] }
 0x175   :  { %v512_v4 = vpop.eup %511  ;;  %v311_v15 = vmul.f32 %v510_v6, %v295_v11 }
 0x176   :  { %v514_v16 = vpop.eup %513  ;;  %v312_v23 = vmul.f32 %v512_v4, %v296_v8  ;;  %v388_v8 = vld [vmem:[#allocation3 + $0x18] sm:$0xff] }
 0x177   :  { %289 = vadd.xlane.f32.xlu0 %v283_v25  ;;  %287 = vadd.xlane.f32.xlu1 %v282_v52  ;;  %v516_v28 = vpop.eup %515  ;;  %v342_v24 = vmul.f32 %v514_v16, %v322_v20 }
 0x178   :  { %v518_v29 = vpop.eup %517  ;;  %v343_v43 = vmul.f32 %v516_v28, %v323_v33 }
 0x179   :  { %v344_v45 = vmul.f32 %v518_v29, %v324_v34  ;;  %v520_v46 = vpop.eup %519 }
 0x17a   :  { %v345_v39 = vmul.f32 %v520_v46, %v325_v38 }
 0x17b   :  { %291 = vadd.xlane.f32.xlu1 %v284_v57 }
 0x1f4   :  { %v274_v61 = vpop.xlane.xlu1 %273 }
 0x1f5   :  { %v313_v1 = vadd.f32 %v309_v59, %v274_v61  ;;  %v368_v61 = vld [vmem:[#allocation2 + $0x18] sm:$0xff] }
 0x1f7   :  { %318 = vst.msk [vmem:[#allocation4] sm:$0xff] %vm43_vm0, %v313_v1 }
 0x1f8   :  { %v276_v7 = vpop.xlane.xlu0 %275 }
 0x1f9   :  { %v314_v13 = vadd.f32 %v310_v5, %v276_v7  ;;  %v387_v5 = vld [vmem:[#allocation3 + $0x10] sm:$0xff] }
 0x1fb   :  { %319 = vst.msk [vmem:[#allocation4 + $0x8] sm:$0xff] %vm43_vm0, %v314_v13 }
 0x1fc   :  { %v278_v17 = vpop.xlane.xlu0 %277 }
 0x1fd   :  { %v315_v27 = vadd.f32 %v311_v15, %v278_v17 }
 0x1fe   :  { %v369_v19 = vld [vmem:[#allocation4] sm:$0xff] }
 0x1ff   :  { %320 = vst.msk [vmem:[#allocation4 + $0x10] sm:$0xff] %vm43_vm0, %v315_v27  ;;  %521 = vlog2.f32 %v369_v19 }
 0x200   :  { %v280_v30 = vpop.xlane.xlu1 %279  ;;  %v286_v32 = vpop.xlane.xlu0 %285 }
 0x201   :  { %v316_v36 = vadd.f32 %v312_v23, %v280_v30  ;;  %v346_v37 = vadd.f32 %v342_v24, %v286_v32 }
 0x202   :  { %v370_v40 = vld [vmem:[#allocation4 + $0x8] sm:$0xff] }
 0x203   :  { %321 = vst.msk [vmem:[#allocation4 + $0x18] sm:$0xff] %vm43_vm0, %v316_v36  ;;  %350 = vst.msk [vmem:[#allocation5] sm:$0xff] %vm43_vm0, %v346_v37  ;;  %523 = vlog2.f32 %v370_v40 }
 0x204   :  { %v288_v48 = vpop.xlane.xlu1 %287  ;;  %v290_v49 = vpop.xlane.xlu0 %289 }
 0x205   :  { %v347_v22 = vadd.f32 %v343_v43, %v288_v48  ;;  %v348_v54 = vadd.f32 %v344_v45, %v290_v49 }
 0x206   :  { %v371_v56 = vld [vmem:[#allocation4 + $0x10] sm:$0xff] }
 0x207   :  { %525 = vlog2.f32 %v371_v56  ;;  %351 = vst.msk [vmem:[#allocation5 + $0x8] sm:$0xff] %vm43_vm0, %v347_v22  ;;  %352 = vst.msk [vmem:[#allocation5 + $0x10] sm:$0xff] %vm43_vm0, %v348_v54 }
 0x208   :  { %v292_v26 = vpop.xlane.xlu1 %291 }
 0x209   :  { %v349_v62 = vadd.f32 %v345_v39, %v292_v26  ;;  %v522_v42 = vpop.eup %521 }
 0x20a   :  { %v372_v2 = vld [vmem:[#allocation4 + $0x18] sm:$0xff]  ;;  %v393_v12 = vld [vmem:[#allocation5] sm:$0xff]  ;;  %v374_v53 = vmul.f32 0.6931472, %v522_v42 }
 0x20b   :  { %527 = vlog2.f32 %v372_v2  ;;  %353 = vst.msk [vmem:[#allocation5 + $0x18] sm:$0xff] %vm43_vm0, %v349_v62 }
 0x20c   :  { %529 = vlog2.f32 %v393_v12  ;;  %v381_v52 = vadd.f32 %v374_v53, %v365_v21 }
 0x20d   :  { %v524_v18 = vpop.eup %523 }
 0x20e   :  { %v394_v9 = vld [vmem:[#allocation5 + $0x8] sm:$0xff]  ;;  %v395_v14 = vld [vmem:[#allocation5 + $0x10] sm:$0xff]  ;;  %v376_v51 = vmul.f32 0.6931472, %v524_v18  ;;  %v389_v50 = vadd.f32 %v385_v47, %v381_v52 }
 0x20f   :  { %531 = vlog2.f32 %v394_v9 }
 0x210   :  { %533 = vlog2.f32 %v395_v14  ;;  %v382_v0 = vadd.f32 %v376_v51, %v366_v10 }
 0x211   :  { %v526_v44 = vpop.eup %525 }
 0x212   :  { %v396_v25 = vld [vmem:[#allocation5 + $0x18] sm:$0xff]  ;;  %v378_v57 = vmul.f32 0.6931472, %v526_v44  ;;  %v390_v7 = vadd.f32 %v386_v63, %v382_v0 }
 0x213   :  { %535 = vlog2.f32 %v396_v25 }
 0x214   :  { %v383_v58 = vadd.f32 %v378_v57, %v367_v41 }
 0x215   :  { %v528_v31 = vpop.eup %527 }
 0x216   :  { %v530_v35 = vpop.eup %529  ;;  %v380_v55 = vmul.f32 0.6931472, %v528_v31  ;;  %v391_v4 = vadd.f32 %v387_v5, %v383_v58 }
 0x217   :  { %v398_v59 = vmul.f32 0.6931472, %v530_v35 }
 0x218   :  { %v384_v6 = vadd.f32 %v380_v55, %v368_v61 }
 0x219   :  { %v532_v60 = vpop.eup %531  ;;  %v912_v1 = vadd.f32 %v398_v59, %v389_v50 }
 0x21a   :  { %v534_v3 = vpop.eup %533  ;;  %v400_v11 = vmul.f32 0.6931472, %v532_v60  ;;  %v392_v19 = vadd.f32 %v388_v8, %v384_v6 }
 0x21b   :  { %v413_v13 = vand.u32 2147483647, %v912_v1  ;;  %v402_v15 = vmul.f32 0.6931472, %v534_v3  ;;  %v409_v51 = vmax.f32 %v912_v1, 0.0 }
 0x21c   :  { %v915_v16 = vadd.f32 %v400_v11, %v390_v7 }
 0x21d   :  { %v536_v17 = vpop.eup %535  ;;  %v417_v20 = vsub.f32 0.0, %v413_v13  ;;  %v917_v27 = vadd.f32 %v402_v15, %v391_v4 }
 0x21e   :  { %v414_v28 = vand.u32 2147483647, %v915_v16  ;;  %v404_v23 = vmul.f32 0.6931472, %v536_v17  ;;  %v410_v31 = vmax.f32 %v915_v16, 0.0 }
 0x21f   :  { %v421_v24 = vmul.f32 1.442695, %v417_v20  ;;  %v415_v29 = vand.u32 2147483647, %v917_v27  ;;  %v411_v60 = vmax.f32 %v917_v27, 0.0 }
 0x220   :  { %v418_v30 = vsub.f32 0.0, %v414_v28  ;;  %v921_v32 = vadd.f32 %v404_v23, %v392_v19 }
 0x221   :  { %537 = vpow2.f32 %v421_v24  ;;  %v419_v33 = vsub.f32 0.0, %v415_v29 }
 0x222   :  { %v423_v34 = vmul.f32 1.442695, %v418_v30  ;;  %v416_v36 = vand.u32 2147483647, %v921_v32  ;;  %v412_v7 = vmax.f32 %v921_v32, 0.0 }
 0x223   :  { %v425_v37 = vmul.f32 1.442695, %v419_v33 }
 0x224   :  { %539 = vpow2.f32 %v423_v34  ;;  %v420_v40 = vsub.f32 0.0, %v416_v36 }
 0x225   :  { %541 = vpow2.f32 %v425_v37 }
 0x226   :  { %v427_v43 = vmul.f32 1.442695, %v420_v40 }
 0x228   :  { %543 = vpow2.f32 %v427_v43 }
 0x22b   :  { %v538_v45 = vpop.eup %537 }
 0x22c   :  { %v429_v46 = vadd.f32 1.0, %v538_v45  ;;  %v432_v54 = vmul.f32 -0.5, %v538_v45  ;;  %v435_v12 = vand.u32 2147483647, %v538_v45 }
 0x22e   :  { %v540_v48 = vpop.eup %539  ;;  %545 = vlog2.f32 %v429_v46  ;;  %v433_v62 = vadd.f32 1.0, %v432_v54  ;;  %vm436_vm5 = vcmp.lt.f32.partialorder %v435_v12, 0.0004427343 }
 0x22f   :  { %v542_v49 = vpop.eup %541  ;;  %v438_v38 = vadd.f32 1.0, %v540_v48  ;;  %v441_v26 = vmul.f32 -0.5, %v540_v48  ;;  %v444_v44 = vand.u32 2147483647, %v540_v48 }
 0x230   :  { %v447_v22 = vadd.f32 1.0, %v542_v49  ;;  %v450_v2 = vmul.f32 -0.5, %v542_v49  ;;  %v434_v53 = vmul.f32 %v538_v45, %v433_v62  ;;  %v453_v25 = vand.u32 2147483647, %v542_v49 }
 0x231   :  { %547 = vlog2.f32 %v438_v38  ;;  %v442_v9 = vadd.f32 1.0, %v441_v26  ;;  %vm445_vm6 = vcmp.lt.f32.partialorder %v444_v44, 0.0004427343 }
 0x232   :  { %v544_v56 = vpop.eup %543  ;;  %549 = vlog2.f32 %v447_v22  ;;  %v451_v21 = vadd.f32 1.0, %v450_v2  ;;  %vm454_vm7 = vcmp.lt.f32.partialorder %v453_v25, 0.0004427343 }
 0x233   :  { %v456_v39 = vadd.f32 1.0, %v544_v56  ;;  %v459_v14 = vmul.f32 -0.5, %v544_v56  ;;  %v443_v47 = vmul.f32 %v540_v48, %v442_v9  ;;  %v462_v50 = vand.u32 2147483647, %v544_v56 }
 0x234   :  { %v452_v58 = vmul.f32 %v542_v49, %v451_v21 }
 0x235   :  { %551 = vlog2.f32 %v456_v39  ;;  %v460_v0 = vadd.f32 1.0, %v459_v14  ;;  %vm463_vm8 = vcmp.lt.f32.partialorder %v462_v50, 0.0004427343 }
 0x237   :  { %v461_v6 = vmul.f32 %v544_v56, %v460_v0 }
 0x238   :  { %v546_v42 = vpop.eup %545 }
 0x239   :  { %v431_v18 = vmul.f32 0.6931472, %v546_v42 }
 0x23b   :  { %v548_v52 = vpop.eup %547  ;;  %v437_v57 = vsel %vm436_vm5, %v434_v53, %v431_v18 }
 0x23c   :  { %v550_v10 = vpop.eup %549  ;;  %v465_v35 = vadd.f32 %v437_v57, %v409_v51  ;;  %v440_v41 = vmul.f32 0.6931472, %v548_v52 }
 0x23d   :  { %v449_v55 = vmul.f32 0.6931472, %v550_v10 }
 0x23e   :  { %469 = vst.msk [vmem:[%s946_s2] sm:$0xff] %vm43_vm0, %v465_v35  ;;  %v446_v59 = vsel %vm445_vm6, %v443_v47, %v440_v41 }
 0x23f   :  { %v552_v61 = vpop.eup %551  ;;  %v466_v63 = vadd.f32 %v446_v59, %v410_v31  ;;  %v455_v1 = vsel %vm454_vm7, %v452_v58, %v449_v55 }
 0x240   :  { %v467_v3 = vadd.f32 %v455_v1, %v411_v60  ;;  %v458_v5 = vmul.f32 0.6931472, %v552_v61 }
 0x241   :  { %470 = vst.msk [vmem:[%s946_s2 + $0x8] sm:$0xff] %vm43_vm0, %v466_v63 }
 0x242   :  { %471 = vst.msk [vmem:[%s946_s2 + $0x10] sm:$0xff] %vm43_vm0, %v467_v3  ;;  %v464_v11 = vsel %vm463_vm8, %v461_v6, %v458_v5 }
 0x243   :  { %v468_v13 = vadd.f32 %v464_v11, %v412_v7 }
 0x245   :  { %472 = vst.msk [vmem:[%s946_s2 + $0x18] sm:$0xff] %vm43_vm0, %v468_v13 }
 0x246   :  { %477 = vsyncpa [#allocation7], 1 }
 0x247   :  { %478 = vsyncpa [#allocation9], 1 }

</bundles_post_ra>
